<compile_context>
chip_gen: v6e
topology: v6e:2x2x1
jax: 0.10.0
libtpu: 0.0.40
codegen_flags: <defaults>
</compile_context>

<pallas_src>
import functools
import math

import jax
import jax.numpy as jnp
from jax.experimental import pallas as pl
from jax.experimental.pallas import tpu as pltpu


def _round_up(x, m):
    return ((x + m - 1) // m) * m


# ---------------------------------------------------------------------------
# Kernel 1: fused QKV projection  (x @ [scale*W_q | W_k | W_v])
# ---------------------------------------------------------------------------
def _qkv_proj_kernel(x_ref, w_ref, o_ref):
    o_ref[...] = jnp.dot(
        x_ref[...], w_ref[...], preferred_element_type=jnp.float32
    ).astype(o_ref.dtype)


# ---------------------------------------------------------------------------
# Kernel 2: flash attention over precomputed (pre-scaled) Q and K/V
# ---------------------------------------------------------------------------
def _flash_attn_kernel(q_ref, k_ref, v_ref, *rest, has_bias):
    if has_bias:
        bias_ref, o_ref, m_sc, l_sc, acc_sc = rest
    else:
        bias_ref = None
        o_ref, m_sc, l_sc, acc_sc = rest

    j = pl.program_id(1)

    @pl.when(j == 0)
    def _init():
        m_sc[...] = jnp.full(m_sc.shape, -jnp.inf, m_sc.dtype)
        l_sc[...] = jnp.zeros(l_sc.shape, l_sc.dtype)
        acc_sc[...] = jnp.zeros(acc_sc.shape, acc_sc.dtype)

    # scores: contract the last dims (q @ k.T without a transpose copy).
    s = jax.lax.dot_general(
        q_ref[...], k_ref[...],
        dimension_numbers=(((1,), (1,)), ((), ())),
        preferred_element_type=jnp.float32)
    if has_bias:
        # (1, tk) additive bias row: 0 for real keys, -1e30 for padded keys.
        # Only the (single) partial tail tile carries nonzero entries; the
        # first KV tile always holds real keys, so m_new stays finite.
        s = s + bias_ref[...]

    # Online softmax update (all state math in f32).
    m_prev = m_sc[...]
    m_new = jnp.maximum(m_prev, jnp.max(s, axis=-1, keepdims=True))
    alpha = jnp.exp(m_prev - m_new)
    p = jnp.exp(s - m_new)
    l_sc[...] = alpha * l_sc[...] + jnp.sum(p, axis=-1, keepdims=True)
    acc_sc[...] = alpha * acc_sc[...] + jnp.dot(
        p.astype(v_ref.dtype), v_ref[...], preferred_element_type=jnp.float32)
    m_sc[...] = m_new

    @pl.when(j == pl.num_programs(1) - 1)
    def _finalize():
        inv_l = pl.reciprocal(l_sc[...], approx=True)
        o_ref[...] = (acc_sc[...] * inv_l).astype(o_ref.dtype)


# ---------------------------------------------------------------------------
# Wrapper
# ---------------------------------------------------------------------------
def self_attention_v2(x, w_query, w_key, w_value, *, tq=256, tk=512,
                      compute_dtype=jnp.bfloat16):
    """Forward pass of SelfAttention_v2.

    x: (seq, d_in); w_*: (d_out, d_in) in PyTorch nn.Linear layout (no bias).
    """
    seq, d_in = x.shape
    d_out = w_query.shape[0]
    scale = 1.0 / math.sqrt(d_out)
    out_dtype = x.dtype

    # Lane-dense padded head dim (multiple of 128): unmasked stores, full MXU
    # result width.  Padded columns are zero and sliced off at the end.
    dp = _round_up(max(d_out, 128), 128)

    # Tile sizing.  Q rows and K/V rows are padded independently to multiples
    # of their own tile, so no KV tile is ever fully padding (at most one
    # partial tail tile).
    seq8 = _round_up(seq, 8)
    tq = max(8, min(tq, seq8))
    tk = max(8, min(tk, seq8))
    if tk < seq8:               # multiple KV tiles -> keep tile lane-aligned
        tk = _round_up(tk, 128)
    seq_q_pad = _round_up(seq, tq)
    seq_kv_pad = _round_up(seq, tk)
    # One projection buffer valid for both paddings.
    lcm = tq * tk // math.gcd(tq, tk)
    seq_proj_pad = _round_up(seq, lcm)

    # ---- fused QKV projection (bf16 operands, f32 accumulate) ----
    xp = jnp.pad(x, ((0, seq_proj_pad - seq), (0, 0))).astype(compute_dtype)

    def _pad_w(w):  # (d_out, d_in) -> (d_in, dp), zero-padded head dim
        return jnp.pad(w.T, ((0, 0), (0, dp - d_out)))

    w_cat = jnp.concatenate(
        [_pad_w(w_query * scale),     # fold 1/sqrt(d_out) into W_q (f32)
         _pad_w(w_key),
         _pad_w(w_value)], axis=1).astype(compute_dtype)

    tp = tq  # projection row tile; tq divides seq_proj_pad by construction
    qkv = pl.pallas_call(
        _qkv_proj_kernel,
        out_shape=jax.ShapeDtypeStruct((seq_proj_pad, 3 * dp), compute_dtype),
        grid=(seq_proj_pad // tp,),
        in_specs=[
            pl.BlockSpec((tp, d_in), lambda i: (i, 0)),
            # Constant-index weight block (VMEM resident).  Its redundant
            # double buffer costs 2*d_in*3*dp*2B; for very large d_in on v7x
            # request pl.Buffered(1) via pipeline_mode.
            pl.BlockSpec((d_in, 3 * dp), lambda i: (0, 0)),
        ],
        out_specs=pl.BlockSpec((tp, 3 * dp), lambda i: (i, 0)),
        compiler_params=pltpu.CompilerParams(
            dimension_semantics=("parallel",)),
    )(xp, w_cat)

    # ---- flash attention over the fused QKV buffer ----
    needs_mask = seq_kv_pad != seq
    grid = (seq_q_pad // tq, seq_kv_pad // tk)

    in_specs = [
        pl.BlockSpec((tq, dp), lambda i, j: (i, 0)),   # Q  cols [0, dp)
        pl.BlockSpec((tk, dp), lambda i, j: (j, 1)),   # K  cols [dp, 2dp)
        pl.BlockSpec((tk, dp), lambda i, j: (j, 2)),   # V  cols [2dp, 3dp)
    ]
    operands = [qkv, qkv, qkv]
    if needs_mask:
        col = jnp.arange(seq_kv_pad, dtype=jnp.int32)
        bias = jnp.where(col < seq, 0.0, -1e30).astype(jnp.float32)[None, :]
        in_specs.append(pl.BlockSpec((1, tk), lambda i, j: (0, j)))
        operands.append(bias)

    kernel = functools.partial(_flash_attn_kernel, has_bias=needs_mask)

    out = pl.pallas_call(
        kernel,
        out_shape=jax.ShapeDtypeStruct((seq_q_pad, dp), out_dtype),
        grid=grid,
        in_specs=in_specs,
        out_specs=pl.BlockSpec((tq, dp), lambda i, j: (i, 0)),
        scratch_shapes=[
            pltpu.VMEM((tq, 1), jnp.float32),   # running max m_i
            pltpu.VMEM((tq, 1), jnp.float32),   # running denom l_i
            pltpu.VMEM((tq, dp), jnp.float32),  # output accumulator
        ],
        compiler_params=pltpu.CompilerParams(
            dimension_semantics=("parallel", "arbitrary")),
    )(*operands)

    return out[:seq, :d_out]


def _reference(x, w_query, w_key, w_value):
    q = x @ w_query.T
    k = x @ w_key.T
    v = x @ w_value.T
    scores = q @ k.T
    w = jax.nn.softmax(scores / jnp.sqrt(jnp.float32(k.shape[-1])), axis=-1)
    return w @ v


if __name__ == "__main__":
    seq, d_in, d_out = 8, 32, 16

    key = jax.random.PRNGKey(0)
    kx, kq, kk, kv = jax.random.split(key, 4)

    x = jax.random.normal(kx, (seq, d_in), dtype=jnp.float32)
    # nn.Linear-style init: U(-1/sqrt(d_in), 1/sqrt(d_in)), weights (d_out, d_in).
    bound = 1.0 / math.sqrt(d_in)
    w_query = jax.random.uniform(kq, (d_out, d_in), jnp.float32, -bound, bound)
    w_key = jax.random.uniform(kk, (d_out, d_in), jnp.float32, -bound, bound)
    w_value = jax.random.uniform(kv, (d_out, d_in), jnp.float32, -bound, bound)

    out = self_attention_v2(x, w_query, w_key, w_value)
    out = jax.block_until_ready(out)

    ref = _reference(x, w_query, w_key, w_value)
    assert out.shape == (seq, d_out)
    # bf16 MXU operands + approx reciprocal -> small (<= few 1e-2) deviations
    # from the f32 reference.
    assert jnp.allclose(out, ref, atol=3e-2, rtol=3e-2), "mismatch vs reference"

    print("KERNEL_OK")
</pallas_src>

<mosaic_0001>
module attributes {stable_mosaic.version = 11 : i64} {
  func.func @_qkv_proj_kernel(%arg0: i32, %arg1: memref<8x32xbf16, #tpu.memory_space<vmem>>, %arg2: memref<32x384xbf16, #tpu.memory_space<vmem>>, %arg3: memref<8x384xbf16, #tpu.memory_space<vmem>>) attributes {dimension_semantics = [#tpu.dimension_semantics<parallel>], iteration_bounds = array<i64: 1>, scalar_prefetch = 0 : i64, scratch_operands = 0 : i64, tpu.core_type = #tpu.core_type<tc>, window_params = [{transform_indices = @transform_0, window_bounds = array<i64: 8, 32>}, {pipeline_mode = #tpu.pipeline_mode<synchronous>, transform_indices = @transform_1, window_bounds = array<i64: 32, 384>}, {transform_indices = @transform_2, window_bounds = array<i64: 8, 384>}]} {
    %c0 = arith.constant 0 : index
    %c0_0 = arith.constant 0 : index
    %0 = vector.load %arg1[%c0, %c0_0] : memref<8x32xbf16, #tpu.memory_space<vmem>>, vector<8x32xbf16>
    %c0_1 = arith.constant 0 : index
    %c0_2 = arith.constant 0 : index
    %1 = vector.load %arg2[%c0_1, %c0_2] : memref<32x384xbf16, #tpu.memory_space<vmem>>, vector<32x384xbf16>
    %cst = arith.constant dense<0.000000e+00> : vector<8x384xf32>
    %2 = tpu.matmul %0, %1, %cst {dimension_numbers = #tpu.dot_dimension_numbers<[1], [0], [0], [1], [0, 0, 1, 1], [], []>} : vector<8x32xbf16>, vector<32x384xbf16>, vector<8x384xf32> -> vector<8x384xf32>
    %3 = arith.truncf %2 : vector<8x384xf32> to vector<8x384xbf16>
    %c0_3 = arith.constant 0 : index
    %c0_4 = arith.constant 0 : index
    %4 = vector.load %arg3[%c0_3, %c0_4] : memref<8x384xbf16, #tpu.memory_space<vmem>>, vector<8x384xbf16>
    tpu.vector_store %arg3[%c0_3, %c0_4], %3 {strides = array<i32>} : memref<8x384xbf16, #tpu.memory_space<vmem>>, vector<8x384xbf16>,
    return
  }
  func.func @transform_0(%arg0: i32) -> (i32, i32) {
    %c0_i32 = arith.constant 0 : i32
    %c0_i32_0 = arith.constant 0 : i32
    return %arg0, %c0_i32 : i32, i32
  }
  func.func @transform_1(%arg0: i32) -> (i32, i32) {
    %c0_i32 = arith.constant 0 : i32
    %c0_i32_0 = arith.constant 0 : i32
    %c0_i32_1 = arith.constant 0 : i32
    return %c0_i32, %c0_i32_0 : i32, i32
  }
  func.func @transform_2(%arg0: i32) -> (i32, i32) {
    %c0_i32 = arith.constant 0 : i32
    %c0_i32_0 = arith.constant 0 : i32
    return %arg0, %c0_i32 : i32, i32
  }
}

</mosaic_0001>

<bundles_post_ra>
// kernel: tpu_custom_call.1
= control target key start
LH: loop header
LB: loop body
LE: loop exit
PB: predicated region body
PF: predicated region fallthrough
CT: control target
= control target key end

     0   :  { %7 = vsyncpa [#allocation3], 0  ;;  %s333_s0 = inlined_call_operand.hbm [shape: bf16[8,32], index: 0, kind: input, shape index: {}]   ;;  %s334_s1 = inlined_call_operand.hbm [shape: bf16[32,384], index: 1, kind: input, shape index: {}]   ;;  %s335_s2 = inlined_call_operand.hbm [shape: bf16[8,384], index: 2, kind: output, shape index: {}]  }
   0x1   :  { %8 = vsyncpa [#allocation6], 0 }
   0x2   :  { %9 = vsyncpa [#allocation4], 0  ;;  %s301_s9 = smov [#allocation2]   ;;  %s302_s11 = smov [#allocation5]  }
   0x3   :  { %s16_s10 = sshll.u32 %s301_s9, 4  ;;  %s25_s12 = sshll.u32 %s302_s11, 4  ;;  %s17_s10 = int_to_ptr.vmem [resolvable:$true] %s16_s10  ;;  %s26_s12 = int_to_ptr.vmem [resolvable:$true] %s25_s12 }
   0x4   :  { %s243_s13 = scalar_lea.vmem %s17_s10, 64  ;;  %p248_p1 = scmp.lt.s32.totalorder %s17_s10, %s17_s10 }
   0x5   :  { %p244_p0 = scmp.ne.s32.totalorder %s17_s10, %s243_s13  ;;  %p249_p2 = scmp.lt.s32.totalorder %s243_s13, %s243_s13 }
   0x7   :  { %p250_p3 = por %p249_p2, %p248_p1 }
   0x9   :  { %p251_p4 = pnand %p250_p3, %p244_p0 }
   0xb   :  { %254 = shalt.err (!%p251_p4)
}
   0xc   :  { %19 = dma.hbm_to_vmem [thread:$0]  %s333_s0, 64, %s17_s10, [#allocation3]  }
   0xd   :  { %s263_s16 = scalar_lea.vmem %s26_s12, 768  ;;  %p268_p6 = scmp.lt.s32.totalorder %s26_s12, %s26_s12 }
   0xe   :  { %p264_p5 = scmp.ne.s32.totalorder %s26_s12, %s263_s16  ;;  %p269_p7 = scmp.lt.s32.totalorder %s263_s16, %s263_s16 }
  0x10   :  { %p270_p8 = por %p269_p7, %p268_p6 }
  0x12   :  { %p271_p9 = pnand %p270_p8, %p264_p5 }
  0x14   :  { %274 = shalt.err (!%p271_p9)
}
  0x15   :  { %s303_s17 = smov 192   ;;  %s304_s18 = smov 12  }
  0x16   :  { %31 = dma.hbm_to_vmem [thread:$0]  %s334_s1, 768, %s26_s12, [#allocation6], %s303_s17, %s303_s17, %s304_s18  }
  0x17   :  { %295 = dma.done.wait [#allocation3], 64  }
  0x18   :  { %296 = vsyncadd [#allocation3], 4294967232 }
  0x19   :  { %297 = dma.done.wait [#allocation6], 768  }
  0x1a   :  { %298 = vsyncadd [#allocation6], 4294966528  ;;  %v305_v0 = vmov 0.0   ;;  %vm306_vm0 = vmmov 0   ;;  %v307_v1 = vmov 0   ;;  %vm80_vm1 = vcmask 261120  }
  0x1b   :  { %211 = vmatprep.subr.bf16.mxu1 %v305_v0  ;;  %215 = vmatprep.mubr.msk.bf16.mxu1 %vm306_vm0, %v305_v0  ;;  %v227_v2 = vld [vmem:[#allocation5 + $0x1c] ss:$12 sps:$4 sm:$0xff]   ;;  %v229_v3 = vld [vmem:[#allocation5 + $0x20] ss:$12 sps:$4 sm:$0xff]   ;;  %v230_v4 = vld [vmem:[#allocation5 + $0x18] ss:$12 sps:$4 sm:$0xff]  }
  0x1c   :  { %116 = vmatprep.mubr.bf16.mxu0 %v307_v1  ;;  %96 = vmatprep.subr.bf16.mxu0 %v227_v2  ;;  %v231_v5 = vld [vmem:[#allocation5 + $0x4] ss:$12 sps:$4 sm:$0xff]   ;;  %v233_v6 = vld [vmem:[#allocation5 + $0x8] ss:$12 sps:$4 sm:$0xff]   ;;  %v234_v7 = vld [vmem:[#allocation5] ss:$12 sps:$4 sm:$0xff]  }
  0x1d   :  { %212 = vmatpush3.bf16.msra.mxu1 %v229_v3  ;;  %97 = vmatpush1.bf16.msra.mxu0 %v230_v4  ;;  %v39_v8 = vld [vmem:[#allocation2] sm:$0xf]  ;;  %s308_s0 = smov [#allocation7]  }
  0x1e   :  { %213 = vmatprep.subr.bf16.mxu1 %v305_v0  ;;  %98 = vmatprep.subr.bf16.mxu0 %v231_v5  ;;  %s186_s1 = sshll.u32 %s308_s0, 4  ;;  %s187_s1 = int_to_ptr.vmem [resolvable:$true] %s186_s1 }
  0x1f   :  { %s275_s21 = scalar_lea.vmem %s187_s1, 192  ;;  %p280_p11 = scmp.lt.s32.totalorder %s187_s1, %s187_s1 }
  0x20   :  { %p276_p10 = scmp.ne.s32.totalorder %s187_s1, %s275_s21  ;;  %p281_p12 = scmp.lt.s32.totalorder %s275_s21, %s275_s21 }
  0x21   :  { %214 = vmatpush3.bf16.msra.mxu1 %v233_v6  ;;  %99 = vmatpush1.bf16.msra.mxu0 %v234_v7 }
  0x22   :  { %p282_p13 = por %p281_p12, %p280_p11 }
  0x24   :  { %216 = vmatmul.mubr.msk.bf16.vlgmr.msra.gmra.mxu1 %vm80_vm1, %v39_v8  ;;  %202 = vmatmul.mubr.msk.bf16.vlgmr.msra.gmra.mxu0 %vm80_vm1, %v39_v8  ;;  %p283_p0 = pnand %p282_p13, %p276_p10 }
  0xe4   :  { %v159_v9 = vpop.f32.mrf.mxu1  ;;  %v118_v11 = vpop.f32.mrf.mxu0 }
  0xe5   :  { %v207_v10 = vpack.c.bf16 %v159_v9, %v159_v9 }
  0xe6   :  { %v217_v12 = vpop.f32.mrf.mxu1  ;;  %v120_v13 = vpop.f32.mrf.mxu0 }
  0xe7   :  { %179 = vst [vmem:[#allocation7 + $0x8] sm:$0xf] %v207_v10  ;;  %v206_v14 = vpack.c.bf16 %v120_v13, %v118_v11 }
  0xe8   :  { %v162_v15 = vpop.f32.mrf.mxu1  ;;  %v122_v16 = vpop.f32.mrf.mxu0 }
  0xe9   :  { %178 = vst [vmem:[#allocation7] sm:$0xff] %v206_v14 }
  0xea   :  { %v218_v17 = vpop.f32.mrf.mxu1  ;;  %v123_v18 = vpop.f32.mrf.mxu0 }
  0xeb   :  { %286 = shalt.err (!%p283_p0)
}
  0xec   :  { %189 = dma.vmem_to_hbm [thread:$0]  %s187_s1, 192, %s335_s2, [#allocation4]  }
  0xed   :  { %299 = dma.done.wait [#allocation4], 192  }
  0xee   :  { %300 = vsyncadd [#allocation4], 4294967104 }
  0xef   :  { %193 = vsyncpa [#allocation3], 1 }
  0xf0   :  { %194 = vsyncpa [#allocation6], 1 }
  0xf1   :  { %195 = vsyncpa [#allocation4], 1 }

</bundles_post_ra>
